<compile_context>
chip_gen: v6e
topology: v6e:2x2x1
jax: 0.10.0
libtpu: 0.0.40
codegen_flags: <defaults>
</compile_context>

<pallas_src>
import jax
import jax.numpy as jnp
from jax import lax
from jax.experimental import pallas as pl
from jax.experimental.pallas import tpu as pltpu

_INV_SQRT2 = 0.7071067811865476


def _mlp_block_kernel(x_ref, w_ref, b_ref, o_ref):
    # x_ref: [TILE_M, D]   input rows (input dtype; f32 accumulation on MXU)
    # w_ref: [D_out, D_in] PyTorch nn.Linear weight, un-transposed
    # b_ref: [1, D_out]
    x = x_ref[...]
    # x @ W^T without a transposed HBM copy: contract x dim 1 with w dim 1.
    h = lax.dot_general(
        x, w_ref[...],
        dimension_numbers=(((1,), (1,)), ((), ())),
        preferred_element_type=jnp.float32,
    )
    h = h + b_ref[...].astype(jnp.float32)
    # Exact (erf) GELU -- matches torch.nn.GELU() default (approximate='none').
    g = 0.5 * h * (1.0 + lax.erf(h * _INV_SQRT2))
    # Residual add in f32, single cast back to the output dtype.
    o_ref[...] = (x.astype(jnp.float32) + g).astype(o_ref.dtype)


def _round_up(n, m):
    return ((n + m - 1) // m) * m


def _vmem_capacity_bytes():
    try:
        return int(pltpu.get_tpu_info().vmem_capacity_bytes)
    except Exception:
        return 64 << 20  # conservative: v7x per-TensorCore VMEM


def _vmem_need(tile_m, d, x_itemsize, w_itemsize, single_buffer_weights=True):
    weight_bytes = (1 if single_buffer_weights else 2) * (d * d + d) * w_itemsize
    act_bytes = 4 * tile_m * d * x_itemsize      # x + out tiles, double-buffered
    f32_tmp_bytes = 2 * tile_m * d * 4           # matmul result + GELU temporaries
    return weight_bytes + act_bytes + f32_tmp_bytes


def _choose_tile_m(m, d, x_itemsize, w_itemsize, budget_bytes, mult):
    """Largest row tile (multiple of `mult`) whose working set fits the budget."""
    m_cap = max(mult, _round_up(m, mult))
    best = mult
    for tile_m in (2048, 1024, 512, 256, 128, 64, 32, 16, 8):
        if tile_m % mult or tile_m > m_cap:
            continue
        if _vmem_need(tile_m, d, x_itemsize, w_itemsize) <= budget_bytes:
            best = tile_m
            break
    # Megacore: keep >= ~8 grid steps when M is large (v7x has 2 TCs and
    # "parallel" shards the grid across them); never shrink below 512 rows so
    # 1-TC chips (v5e/v6e) keep ~85%+ of HBM roofline.
    steps_cap = _round_up(max(1, -(-m // 8)), mult)
    if best > 512:
        best = max(512, min(best, steps_cap))
    # TODO(synk): for very large D, where even the single [D, D] weight exceeds
    # the budget (D >= ~2.8k f32 on v7x's 64 MiB), add an N grid axis so only a
    # [D, TILE_N] weight slab (ideally bf16, TILE_N a multiple of 256) is
    # VMEM-resident per step.
    return best


def _pallas_mlp(x2, weight, b2, *, tile_m, single_buffer_weights,
                vmem_limit_bytes, cost, donate_x):
    M, D = x2.shape
    grid = (pl.cdiv(M, tile_m),)
    resident_kwargs = {}
    if single_buffer_weights:
        # Constant index_map => block is never re-fetched; one buffer suffices
        # and halves the weight's VMEM reservation.
        resident_kwargs = dict(pipeline_mode=pl.Buffered(1))
    in_specs = [
        pl.BlockSpec((tile_m, D), lambda i: (i, 0)),                     # x rows
        pl.BlockSpec((D, D), lambda i: (0, 0), **resident_kwargs),       # weight
        pl.BlockSpec((1, D), lambda i: (0, 0), **resident_kwargs),       # bias
    ]
    return pl.pallas_call(
        _mlp_block_kernel,
        out_shape=jax.ShapeDtypeStruct((M, D), x2.dtype),
        grid=grid,
        in_specs=in_specs,
        out_specs=pl.BlockSpec((tile_m, D), lambda i: (i, 0)),
        compiler_params=pltpu.CompilerParams(
            dimension_semantics=("parallel",),
            vmem_limit_bytes=vmem_limit_bytes,
        ),
        cost_estimate=cost,
        # Only useful when the caller no longer needs x (saves one [M, D] HBM
        # buffer for this memory-bound residual pattern).
        input_output_aliases=({0: 0} if donate_x else {}),
    )(x2, weight, b2)


def mlp_block(x, weight, bias, *, donate_x=False):
    """x: [B, S, D]; weight: [D, D] (PyTorch Linear layout, out x in); bias: [D]."""
    B, S, D = x.shape
    assert weight.shape == (D, D) and bias.shape == (D,)
    M = B * S

    x2 = x.reshape(M, D)            # free: contiguous row-major view
    b2 = bias.reshape(1, D)
    # NOTE: on bf16-native MXUs (v6e/v7x), pre-cast weight (and activations) to
    # bf16 upstream of this call; f32 accumulation is preserved via
    # preferred_element_type.  Kept in the caller's dtype here to match the
    # f32 PyTorch reference numerics.

    x_itemsize = jnp.dtype(x.dtype).itemsize
    w_itemsize = jnp.dtype(weight.dtype).itemsize
    # Sublane packing: tiles must be multiples of 8 (f32) / 16 (bf16) / 32 (8-bit).
    mult = {4: 8, 2: 16, 1: 32}.get(x_itemsize, 8)

    capacity = _vmem_capacity_bytes()
    budget = int(capacity * 0.8)    # ~102 MiB on v5e/v6e, ~51 MiB on v7x
    tile_m = _choose_tile_m(M, D, x_itemsize, w_itemsize, budget, mult)

    cost = pl.CostEstimate(
        flops=int(2 * M * D * D + 8 * M * D),
        transcendentals=int(M * D),
        bytes_accessed=int(2 * M * D * x_itemsize + (D * D + D) * w_itemsize),
    )

    def _limit(single_buffer):
        need = _vmem_need(tile_m, D, x_itemsize, w_itemsize, single_buffer)
        return int(min(max(need + (8 << 20), 16 << 20), capacity - (4 << 20)))

    try:
        out = _pallas_mlp(
            x2, weight, b2, tile_m=tile_m, single_buffer_weights=True,
            vmem_limit_bytes=_limit(True), cost=cost, donate_x=donate_x)
    except Exception:
        # Fallback if pl.Buffered(1) is unsupported in this jax build: default
        # double-buffered resident weight/bias (same numerics, more VMEM).
        out = _pallas_mlp(
            x2, weight, b2, tile_m=tile_m, single_buffer_weights=False,
            vmem_limit_bytes=_limit(False), cost=cost, donate_x=donate_x)

    return out.reshape(B, S, D)


def _reference(x, weight, bias):
    h = jnp.einsum("bsd,od->bso", x, weight,
                   precision=lax.Precision.HIGHEST) + bias
    g = 0.5 * h * (1.0 + lax.erf(h * _INV_SQRT2))
    return x + g


if __name__ == "__main__":
    key = jax.random.PRNGKey(0)

    # Small shape matching the module spec (size = 32).
    B, S, D = 2, 8, 32
    kx, kw, kb = jax.random.split(key, 3)
    x = jax.random.normal(kx, (B, S, D), dtype=jnp.float32)
    weight = jax.random.normal(kw, (D, D), dtype=jnp.float32) * 0.05
    bias = jax.random.normal(kb, (D,), dtype=jnp.float32) * 0.05

    out = mlp_block(x, weight, bias)
    jax.block_until_ready(out)
    ref = _reference(x, weight, bias)
    assert out.shape == (B, S, D)
    assert jnp.allclose(out, ref, atol=1e-4, rtol=1e-4), "mismatch (small)"

    # Larger lane-dense shape exercising the multi-step grid and the
    # clipped (partial) last block path: M = 74 rows with a 64-row tile.
    B2, S2, D2 = 2, 37, 256
    kx2, kw2, kb2 = jax.random.split(jax.random.PRNGKey(1), 3)
    x_l = jax.random.normal(kx2, (B2, S2, D2), dtype=jnp.float32)
    w_l = jax.random.normal(kw2, (D2, D2), dtype=jnp.float32) * 0.02
    b_l = jax.random.normal(kb2, (D2,), dtype=jnp.float32) * 0.02

    out_l = mlp_block(x_l, w_l, b_l)
    jax.block_until_ready(out_l)
    ref_l = _reference(x_l, w_l, b_l)
    assert out_l.shape == (B2, S2, D2)
    assert jnp.allclose(out_l, ref_l, atol=1e-4, rtol=1e-4), "mismatch (large)"

    print("KERNEL_OK")
</pallas_src>

<mosaic_0001>
module attributes {stable_mosaic.version = 11 : i64} {
  func.func @_mlp_block_kernel(%arg0: i32, %arg1: memref<16x32xf32, #tpu.memory_space<vmem>>, %arg2: memref<32x32xf32, #tpu.memory_space<vmem>>, %arg3: memref<1x32xf32, #tpu.memory_space<vmem>>, %arg4: memref<16x32xf32, #tpu.memory_space<vmem>>) attributes {dimension_semantics = [#tpu.dimension_semantics<parallel>], iteration_bounds = array<i64: 1>, scalar_prefetch = 0 : i64, scratch_operands = 0 : i64, tpu.core_type = #tpu.core_type<tc>, window_params = [{transform_indices = @transform_0, window_bounds = array<i64: 16, 32>}, {pipeline_mode = #tpu.pipeline_mode<synchronous>, transform_indices = @transform_1, window_bounds = array<i64: 32, 32>}, {pipeline_mode = #tpu.pipeline_mode<synchronous>, transform_indices = @transform_2, window_bounds = array<i64: 1, 32>}, {transform_indices = @transform_3, window_bounds = array<i64: 16, 32>}]} {
    %c0 = arith.constant 0 : index
    %c0_0 = arith.constant 0 : index
    %0 = vector.load %arg1[%c0, %c0_0] : memref<16x32xf32, #tpu.memory_space<vmem>>, vector<16x32xf32>
    %c0_1 = arith.constant 0 : index
    %c0_2 = arith.constant 0 : index
    %1 = vector.load %arg2[%c0_1, %c0_2] : memref<32x32xf32, #tpu.memory_space<vmem>>, vector<32x32xf32>
    %cst = arith.constant dense<0.000000e+00> : vector<16x32xf32>
    %2 = tpu.matmul %0, %1, %cst {dimension_numbers = #tpu.dot_dimension_numbers<[1], [1], [0], [0], [0, 0, 1, 0], [], []>} : vector<16x32xf32>, vector<32x32xf32>, vector<16x32xf32> -> vector<16x32xf32>
    %c0_3 = arith.constant 0 : index
    %c0_4 = arith.constant 0 : index
    %3 = vector.load %arg3[%c0_3, %c0_4] : memref<1x32xf32, #tpu.memory_space<vmem>>, vector<1x32xf32>
    %4 = vector.broadcast %3 : vector<1x32xf32> to vector<16x32xf32>
    %5 = arith.addf %2, %4 : vector<16x32xf32>
    %cst_5 = arith.constant 5.000000e-01 : f32
    %6 = vector.broadcast %cst_5 : f32 to vector<16x32xf32>
    %7 = arith.mulf %6, %5 : vector<16x32xf32>
    %cst_6 = arith.constant 0.707106769 : f32
    %8 = vector.broadcast %cst_6 : f32 to vector<16x32xf32>
    %9 = arith.mulf %5, %8 : vector<16x32xf32>
    %10 = math.erf %9 : vector<16x32xf32>
    %cst_7 = arith.constant 1.000000e+00 : f32
    %11 = vector.broadcast %cst_7 : f32 to vector<16x32xf32>
    %12 = arith.addf %11, %10 : vector<16x32xf32>
    %13 = arith.mulf %7, %12 : vector<16x32xf32>
    %14 = arith.addf %0, %13 : vector<16x32xf32>
    %c0_8 = arith.constant 0 : index
    %c0_9 = arith.constant 0 : index
    %15 = vector.load %arg4[%c0_8, %c0_9] : memref<16x32xf32, #tpu.memory_space<vmem>>, vector<16x32xf32>
    tpu.vector_store %arg4[%c0_8, %c0_9], %14 {strides = array<i32>} : memref<16x32xf32, #tpu.memory_space<vmem>>, vector<16x32xf32>,
    return
  }
  func.func @transform_0(%arg0: i32) -> (i32, i32) {
    %c0_i32 = arith.constant 0 : i32
    %c0_i32_0 = arith.constant 0 : i32
    return %arg0, %c0_i32 : i32, i32
  }
  func.func @transform_1(%arg0: i32) -> (i32, i32) {
    %c0_i32 = arith.constant 0 : i32
    %c0_i32_0 = arith.constant 0 : i32
    %c0_i32_1 = arith.constant 0 : i32
    return %c0_i32, %c0_i32_0 : i32, i32
  }
  func.func @transform_2(%arg0: i32) -> (i32, i32) {
    %c0_i32 = arith.constant 0 : i32
    %c0_i32_0 = arith.constant 0 : i32
    %c0_i32_1 = arith.constant 0 : i32
    return %c0_i32, %c0_i32_0 : i32, i32
  }
  func.func @transform_3(%arg0: i32) -> (i32, i32) {
    %c0_i32 = arith.constant 0 : i32
    %c0_i32_0 = arith.constant 0 : i32
    return %arg0, %c0_i32 : i32, i32
  }
}

module attributes {stable_mosaic.version = 11 : i64} {
  func.func @_mlp_block_kernel(%arg0: i32, %arg1: memref<16x32xf32, #tpu.memory_space<vmem>>, %arg2: memref<32x32xf32, #tpu.memory_space<vmem>>, %arg3: memref<1x32xf32, #tpu.memory_space<vmem>>, %arg4: memref<16x32xf32, #tpu.memory_space<vmem>>) attributes {dimension_semantics = [#tpu.dimension_semantics<parallel>], iteration_bounds = array<i64: 1>, scalar_prefetch = 0 : i64, scratch_operands = 0 : i64, tpu.core_type = #tpu.core_type<tc>, window_params = [{transform_indices = @transform_0, window_bounds = array<i64: 16, 32>}, {pipeline_mode = #tpu.pipeline_mode<synchronous>, transform_indices = @transform_1, window_bounds = array<i64: 32, 32>}, {pipeline_mode = #tpu.pipeline_mode<synchronous>, transform_indices = @transform_2, window_bounds = array<i64: 1, 32>}, {transform_indices = @transform_3, window_bounds = array<i64: 16, 32>}]} {
    %c0 = arith.constant 0 : index
    %c0_0 = arith.constant 0 : index
    %0 = vector.load %arg1[%c0, %c0_0] : memref<16x32xf32, #tpu.memory_space<vmem>>, vector<16x32xf32>
    %c0_1 = arith.constant 0 : index
    %c0_2 = arith.constant 0 : index
    %1 = vector.load %arg2[%c0_1, %c0_2] : memref<32x32xf32, #tpu.memory_space<vmem>>, vector<32x32xf32>
    %cst = arith.constant dense<0.000000e+00> : vector<16x32xf32>
    %2 = tpu.matmul %0, %1, %cst {dimension_numbers = #tpu.dot_dimension_numbers<[1], [1], [0], [0], [0, 0, 1, 0], [], []>} : vector<16x32xf32>, vector<32x32xf32>, vector<16x32xf32> -> vector<16x32xf32>
    %c0_3 = arith.constant 0 : index
    %c0_4 = arith.constant 0 : index
    %3 = vector.load %arg3[%c0_3, %c0_4] : memref<1x32xf32, #tpu.memory_space<vmem>>, vector<1x32xf32>
    %4 = vector.broadcast %3 : vector<1x32xf32> to vector<16x32xf32>
    %5 = arith.addf %2, %4 : vector<16x32xf32>
    %cst_5 = arith.constant 5.000000e-01 : f32
    %6 = vector.broadcast %cst_5 : f32 to vector<16x32xf32>
    %7 = arith.mulf %6, %5 : vector<16x32xf32>
    %cst_6 = arith.constant 0.707106769 : f32
    %8 = vector.broadcast %cst_6 : f32 to vector<16x32xf32>
    %9 = arith.mulf %5, %8 : vector<16x32xf32>
    %10 = math.erf %9 : vector<16x32xf32>
    %cst_7 = arith.constant 1.000000e+00 : f32
    %11 = vector.broadcast %cst_7 : f32 to vector<16x32xf32>
    %12 = arith.addf %11, %10 : vector<16x32xf32>
    %13 = arith.mulf %7, %12 : vector<16x32xf32>
    %14 = arith.addf %0, %13 : vector<16x32xf32>
    %c0_8 = arith.constant 0 : index
    %c0_9 = arith.constant 0 : index
    %15 = vector.load %arg4[%c0_8, %c0_9] : memref<16x32xf32, #tpu.memory_space<vmem>>, vector<16x32xf32>
    tpu.vector_store %arg4[%c0_8, %c0_9], %14 {strides = array<i32>} : memref<16x32xf32, #tpu.memory_space<vmem>>, vector<16x32xf32>,
    return
  }
  func.func @transform_0(%arg0: i32) -> (i32, i32) {
    %c0_i32 = arith.constant 0 : i32
    %c0_i32_0 = arith.constant 0 : i32
    return %arg0, %c0_i32 : i32, i32
  }
  func.func @transform_1(%arg0: i32) -> (i32, i32) {
    %c0_i32 = arith.constant 0 : i32
    %c0_i32_0 = arith.constant 0 : i32
    %c0_i32_1 = arith.constant 0 : i32
    return %c0_i32, %c0_i32_0 : i32, i32
  }
  func.func @transform_2(%arg0: i32) -> (i32, i32) {
    %c0_i32 = arith.constant 0 : i32
    %c0_i32_0 = arith.constant 0 : i32
    %c0_i32_1 = arith.constant 0 : i32
    return %c0_i32, %c0_i32_0 : i32, i32
  }
  func.func @transform_3(%arg0: i32) -> (i32, i32) {
    %c0_i32 = arith.constant 0 : i32
    %c0_i32_0 = arith.constant 0 : i32
    return %arg0, %c0_i32 : i32, i32
  }
}

</mosaic_0001>

<bundles_post_ra>
// kernel: tpu_custom_call.1
= control target key start
LH: loop header
LB: loop body
LE: loop exit
PB: predicated region body
PF: predicated region fallthrough
CT: control target
= control target key end

     0   :  { %8 = vsyncpa [#allocation3], 0  ;;  %s339_s0 = inlined_call_operand.hbm [shape: f32[16,32], index: 0, kind: input, shape index: {}]   ;;  %s340_s1 = inlined_call_operand.hbm [shape: f32[32,32], index: 1, kind: input, shape index: {}]   ;;  %s341_s2 = inlined_call_operand.vmem [shape: f32[1,32], index: 2, kind: input, shape index: {}]   ;;  %s342_s3 = inlined_call_operand.hbm [shape: f32[16,32], index: 3, kind: output, shape index: {}]  }
   0x1   :  { %9 = vsyncpa [#allocation6], 0 }
   0x2   :  { %10 = vsyncpa [#allocation4], 0  ;;  %s281_s12 = smov [#allocation2]  }
   0x3   :  { %s16_s13 = sshll.u32 %s281_s12, 4  ;;  %s17_s13 = int_to_ptr.vmem [resolvable:$true] %s16_s13 }
   0x4   :  { %s223_s14 = scalar_lea.vmem %s17_s13, 256  ;;  %p228_p1 = scmp.lt.s32.totalorder %s17_s13, %s17_s13 }
   0x5   :  { %p224_p0 = scmp.ne.s32.totalorder %s17_s13, %s223_s14  ;;  %p229_p2 = scmp.lt.s32.totalorder %s223_s14, %s223_s14 }
   0x7   :  { %p230_p3 = por %p229_p2, %p228_p1 }
   0x9   :  { %p231_p4 = pnand %p230_p3, %p224_p0 }
   0xb   :  { %234 = shalt.err (!%p231_p4)
}
   0xc   :  { %s282_s15 = smov 128   ;;  %s283_s16 = smov 8  }
   0xd   :  { %22 = dma.hbm_to_vmem [thread:$0]  %s339_s0, 256, %s17_s13, [#allocation3], %s282_s15, %s282_s15, %s283_s16  }
   0xe   :  { %s284_s19 = smov [#allocation5]  }
   0xf   :  { %s28_s20 = sshll.u32 %s284_s19, 4  ;;  %s29_s20 = int_to_ptr.vmem [resolvable:$true] %s28_s20 }
  0x10   :  { %s243_s21 = scalar_lea.vmem %s29_s20, 512  ;;  %p248_p6 = scmp.lt.s32.totalorder %s29_s20, %s29_s20 }
  0x11   :  { %p244_p5 = scmp.ne.s32.totalorder %s29_s20, %s243_s21  ;;  %p249_p7 = scmp.lt.s32.totalorder %s243_s21, %s243_s21 }
  0x13   :  { %p250_p8 = por %p249_p7, %p248_p6 }
  0x15   :  { %p251_p9 = pnand %p250_p8, %p244_p5 }
  0x17   :  { %254 = shalt.err (!%p251_p9)
}
  0x18   :  { %34 = dma.hbm_to_vmem [thread:$0]  %s340_s1, 512, %s29_s20, [#allocation6], %s282_s15, %s282_s15, %s283_s16  }
  0x19   :  { %275 = dma.done.wait [#allocation3], 256  }
  0x1a   :  { %276 = vsyncadd [#allocation3], 4294967040 }
  0x1b   :  { %277 = dma.done.wait [#allocation6], 512  }
  0x1c   :  { %278 = vsyncadd [#allocation6], 4294966784  ;;  %vm56_vm0 = vcmask 261120   ;;  %v48_v0 = vld [vmem:[#allocation5 + $0x18] sm:$0xff]  ;;  %v47_v1 = vld [vmem:[#allocation5 + $0x10] sm:$0xff]  ;;  %s285_s24 = smov [#allocation7]  }
  0x1d   :  { %195 = vmatprep.subr.msk.mxu0 %vm56_vm0, %v48_v0  ;;  %v43_v2 = vld [vmem:[#allocation2] sm:$0xff]  ;;  %v46_v3 = vld [vmem:[#allocation5 + $0x8] sm:$0xff]  ;;  %v45_v4 = vld [vmem:[#allocation5] sm:$0xff]  ;;  %s169_s25 = sshll.u32 %s285_s24, 4  ;;  %s170_s25 = int_to_ptr.vmem [resolvable:$true] %s169_s25 }
  0x1e   :  { %196 = vmatpush3.xpose.msk.msra.mxu0 %vm56_vm0, %v48_v0  ;;  %203 = vmatprep.mubr.msk.f32.mxu0 %vm56_vm0, %v43_v2  ;;  %v44_v5 = vld [vmem:[#allocation2 + $0x8] sm:$0xff]  ;;  %v182_v6 = vld [vmem:[%s341_s2] ss:$0 sm:$0xff]  ;;  %s255_s2 = scalar_lea.vmem %s170_s25, 256  ;;  %p260_p11 = scmp.lt.s32.totalorder %s170_s25, %s170_s25 }
  0x1f   :  { %197 = vmatprep.subr.msk.mxu0 %vm56_vm0, %v47_v1  ;;  %p256_p10 = scmp.ne.s32.totalorder %s170_s25, %s255_s2  ;;  %p261_p12 = scmp.lt.s32.totalorder %s255_s2, %s255_s2 }
  0x21   :  { %p262_p13 = por %p261_p12, %p260_p11 }
  0x22   :  { %198 = vmatpush3.xpose.msk.msra.mxu0 %vm56_vm0, %v47_v1 }
  0x23   :  { %199 = vmatprep.subr.msk.mxu0 %vm56_vm0, %v46_v3  ;;  %p263_p0 = pnand %p262_p13, %p256_p10 }
  0x26   :  { %200 = vmatpush3.xpose.msk.msra.mxu0 %vm56_vm0, %v46_v3 }
  0x27   :  { %201 = vmatprep.subr.msk.mxu0 %vm56_vm0, %v45_v4 }
  0x2a   :  { %202 = vmatpush3.xpose.msk.msra.mxu0 %vm56_vm0, %v45_v4 }
  0x2d   :  { %204 = vmatmul.mubr.msk.f32.vlgmr.msra.gmra.mxu0 %vm56_vm0, %v44_v5 }
  0xed   :  { %v205_v7 = vpop.f32.mrf.mxu0 }
  0xee   :  { %v147_v8 = vadd.f32 %v205_v7, %v182_v6 }
  0xef   :  { %v141_v9 = vpop.f32.mrf.mxu0 }
  0xf0   :  { %v153_v10 = vmul.f32 0.70710677, %v147_v8  ;;  %v142_v11 = vadd.f32 %v182_v6, %v141_v9  ;;  %v151_v14 = vmul.f32 0.5, %v147_v8 }
  0xf2   :  { %211 = verf.f32 %v153_v10  ;;  %v152_v12 = vmul.f32 0.70710677, %v142_v11  ;;  %v150_v18 = vmul.f32 0.5, %v142_v11 }
  0xf4   :  { %213 = verf.f32 %v152_v12 }
  0xff   :  { %v212_v13 = vpop.eup %211 }
 0x100   :  { %v157_v15 = vadd.f32 1.0, %v212_v13 }
 0x101   :  { %v214_v16 = vpop.eup %213 }
 0x102   :  { %v159_v17 = vmul.f32 %v157_v15, %v151_v14  ;;  %v156_v19 = vadd.f32 1.0, %v214_v16 }
 0x104   :  { %v161_v20 = vadd.f32 %v159_v17, %v44_v5  ;;  %v158_v21 = vmul.f32 %v156_v19, %v150_v18 }
 0x106   :  { %163 = vst.msk [vmem:[#allocation7 + $0x8] sm:$0xff] %vm56_vm0, %v161_v20  ;;  %v160_v22 = vadd.f32 %v158_v21, %v43_v2 }
 0x108   :  { %162 = vst.msk [vmem:[#allocation7] sm:$0xff] %vm56_vm0, %v160_v22 }
 0x109   :  { %266 = shalt.err (!%p263_p0)
}
 0x10a   :  { %175 = dma.vmem_to_hbm [thread:$0]  %s170_s25, 256, %s342_s3, [#allocation4], %s282_s15, %s282_s15, %s283_s16  }
 0x10b   :  { %279 = dma.done.wait [#allocation4], 256  }
 0x10c   :  { %280 = vsyncadd [#allocation4], 4294967040 }
 0x10d   :  { %179 = vsyncpa [#allocation3], 1 }
 0x10e   :  { %180 = vsyncpa [#allocation6], 1 }
 0x10f   :  { %181 = vsyncpa [#allocation4], 1 }

// kernel: tpu_custom_call.1
= control target key start
LH: loop header
LB: loop body
LE: loop exit
PB: predicated region body
PF: predicated region fallthrough
CT: control target
= control target key end

     0   :  { %8 = vsyncpa [#allocation3], 0  ;;  %s339_s0 = inlined_call_operand.hbm [shape: f32[16,32], index: 0, kind: input, shape index: {}]   ;;  %s340_s1 = inlined_call_operand.hbm [shape: f32[32,32], index: 1, kind: input, shape index: {}]   ;;  %s341_s2 = inlined_call_operand.vmem [shape: f32[1,32], index: 2, kind: input, shape index: {}]   ;;  %s342_s3 = inlined_call_operand.hbm [shape: f32[16,32], index: 3, kind: output, shape index: {}]  }
   0x1   :  { %9 = vsyncpa [#allocation6], 0 }
   0x2   :  { %10 = vsyncpa [#allocation4], 0  ;;  %s281_s12 = smov [#allocation2]  }
   0x3   :  { %s16_s13 = sshll.u32 %s281_s12, 4  ;;  %s17_s13 = int_to_ptr.vmem [resolvable:$true] %s16_s13 }
   0x4   :  { %s223_s14 = scalar_lea.vmem %s17_s13, 256  ;;  %p228_p1 = scmp.lt.s32.totalorder %s17_s13, %s17_s13 }
   0x5   :  { %p224_p0 = scmp.ne.s32.totalorder %s17_s13, %s223_s14  ;;  %p229_p2 = scmp.lt.s32.totalorder %s223_s14, %s223_s14 }
   0x7   :  { %p230_p3 = por %p229_p2, %p228_p1 }
   0x9   :  { %p231_p4 = pnand %p230_p3, %p224_p0 }
   0xb   :  { %234 = shalt.err (!%p231_p4)
}
   0xc   :  { %s282_s15 = smov 128   ;;  %s283_s16 = smov 8  }
   0xd   :  { %22 = dma.hbm_to_vmem [thread:$0]  %s339_s0, 256, %s17_s13, [#allocation3], %s282_s15, %s282_s15, %s283_s16  }
   0xe   :  { %s284_s19 = smov [#allocation5]  }
   0xf   :  { %s28_s20 = sshll.u32 %s284_s19, 4  ;;  %s29_s20 = int_to_ptr.vmem [resolvable:$true] %s28_s20 }
  0x10   :  { %s243_s21 = scalar_lea.vmem %s29_s20, 512  ;;  %p248_p6 = scmp.lt.s32.totalorder %s29_s20, %s29_s20 }
  0x11   :  { %p244_p5 = scmp.ne.s32.totalorder %s29_s20, %s243_s21  ;;  %p249_p7 = scmp.lt.s32.totalorder %s243_s21, %s243_s21 }
  0x13   :  { %p250_p8 = por %p249_p7, %p248_p6 }
  0x15   :  { %p251_p9 = pnand %p250_p8, %p244_p5 }
  0x17   :  { %254 = shalt.err (!%p251_p9)
}
  0x18   :  { %34 = dma.hbm_to_vmem [thread:$0]  %s340_s1, 512, %s29_s20, [#allocation6], %s282_s15, %s282_s15, %s283_s16  }
  0x19   :  { %275 = dma.done.wait [#allocation3], 256  }
  0x1a   :  { %276 = vsyncadd [#allocation3], 4294967040 }
  0x1b   :  { %277 = dma.done.wait [#allocation6], 512  }
  0x1c   :  { %278 = vsyncadd [#allocation6], 4294966784  ;;  %vm56_vm0 = vcmask 261120   ;;  %v48_v0 = vld [vmem:[#allocation5 + $0x18] sm:$0xff]  ;;  %v47_v1 = vld [vmem:[#allocation5 + $0x10] sm:$0xff]  ;;  %s285_s24 = smov [#allocation7]  }
  0x1d   :  { %195 = vmatprep.subr.msk.mxu0 %vm56_vm0, %v48_v0  ;;  %v43_v2 = vld [vmem:[#allocation2] sm:$0xff]  ;;  %v46_v3 = vld [vmem:[#allocation5 + $0x8] sm:$0xff]  ;;  %v45_v4 = vld [vmem:[#allocation5] sm:$0xff]  ;;  %s169_s25 = sshll.u32 %s285_s24, 4  ;;  %s170_s25 = int_to_ptr.vmem [resolvable:$true] %s169_s25 }
  0x1e   :  { %196 = vmatpush3.xpose.msk.msra.mxu0 %vm56_vm0, %v48_v0  ;;  %203 = vmatprep.mubr.msk.f32.mxu0 %vm56_vm0, %v43_v2  ;;  %v44_v5 = vld [vmem:[#allocation2 + $0x8] sm:$0xff]  ;;  %v182_v6 = vld [vmem:[%s341_s2] ss:$0 sm:$0xff]  ;;  %s255_s2 = scalar_lea.vmem %s170_s25, 256  ;;  %p260_p11 = scmp.lt.s32.totalorder %s170_s25, %s170_s25 }
  0x1f   :  { %197 = vmatprep.subr.msk.mxu0 %vm56_vm0, %v47_v1  ;;  %p256_p10 = scmp.ne.s32.totalorder %s170_s25, %s255_s2  ;;  %p261_p12 = scmp.lt.s32.totalorder %s255_s2, %s255_s2 }
  0x21   :  { %p262_p13 = por %p261_p12, %p260_p11 }
  0x22   :  { %198 = vmatpush3.xpose.msk.msra.mxu0 %vm56_vm0, %v47_v1 }
  0x23   :  { %199 = vmatprep.subr.msk.mxu0 %vm56_vm0, %v46_v3  ;;  %p263_p0 = pnand %p262_p13, %p256_p10 }
  0x26   :  { %200 = vmatpush3.xpose.msk.msra.mxu0 %vm56_vm0, %v46_v3 }
  0x27   :  { %201 = vmatprep.subr.msk.mxu0 %vm56_vm0, %v45_v4 }
  0x2a   :  { %202 = vmatpush3.xpose.msk.msra.mxu0 %vm56_vm0, %v45_v4 }
  0x2d   :  { %204 = vmatmul.mubr.msk.f32.vlgmr.msra.gmra.mxu0 %vm56_vm0, %v44_v5 }
  0xed   :  { %v205_v7 = vpop.f32.mrf.mxu0 }
  0xee   :  { %v147_v8 = vadd.f32 %v205_v7, %v182_v6 }
  0xef   :  { %v141_v9 = vpop.f32.mrf.mxu0 }
  0xf0   :  { %v153_v10 = vmul.f32 0.70710677, %v147_v8  ;;  %v142_v11 = vadd.f32 %v182_v6, %v141_v9  ;;  %v151_v14 = vmul.f32 0.5, %v147_v8 }
  0xf2   :  { %211 = verf.f32 %v153_v10  ;;  %v152_v12 = vmul.f32 0.70710677, %v142_v11  ;;  %v150_v18 = vmul.f32 0.5, %v142_v11 }
  0xf4   :  { %213 = verf.f32 %v152_v12 }
  0xff   :  { %v212_v13 = vpop.eup %211 }
 0x100   :  { %v157_v15 = vadd.f32 1.0, %v212_v13 }
 0x101   :  { %v214_v16 = vpop.eup %213 }
 0x102   :  { %v159_v17 = vmul.f32 %v157_v15, %v151_v14  ;;  %v156_v19 = vadd.f32 1.0, %v214_v16 }
 0x104   :  { %v161_v20 = vadd.f32 %v159_v17, %v44_v5  ;;  %v158_v21 = vmul.f32 %v156_v19, %v150_v18 }
 0x106   :  { %163 = vst.msk [vmem:[#allocation7 + $0x8] sm:$0xff] %vm56_vm0, %v161_v20  ;;  %v160_v22 = vadd.f32 %v158_v21, %v43_v2 }
 0x108   :  { %162 = vst.msk [vmem:[#allocation7] sm:$0xff] %vm56_vm0, %v160_v22 }
 0x109   :  { %266 = shalt.err (!%p263_p0)
}
 0x10a   :  { %175 = dma.vmem_to_hbm [thread:$0]  %s170_s25, 256, %s342_s3, [#allocation4], %s282_s15, %s282_s15, %s283_s16  }
 0x10b   :  { %279 = dma.done.wait [#allocation4], 256  }
 0x10c   :  { %280 = vsyncadd [#allocation4], 4294967040 }
 0x10d   :  { %179 = vsyncpa [#allocation3], 1 }
 0x10e   :  { %180 = vsyncpa [#allocation6], 1 }
 0x10f   :  { %181 = vsyncpa [#allocation4], 1 }

</bundles_post_ra>
